<compile_context>
chip_gen: v7x
topology: tpu7x:2x2x1
jax: 0.10.0
libtpu: 0.0.40
codegen_flags: <defaults>
</compile_context>

<pallas_src>
import math

import jax
import jax.numpy as jnp
from jax.experimental import pallas as pl
from jax.experimental.pallas import tpu as pltpu


def _round_up(a, b):
    return (a + b - 1) // b * b


def make_label_smoothing_loss(size, padding_idx, smoothing=0.0):
    assert size > 2, "label smoothing requires size > 2"
    confidence = 1.0 - smoothing
    smooth_val = smoothing / (size - 2)
    # 0 * log 0 == 0 convention (matches nn.KLDivLoss).
    log_c = math.log(confidence) if confidence > 0.0 else 0.0
    log_s = math.log(smooth_val) if smooth_val > 0.0 else 0.0
    # sum_j p_j*log(p_j) for one non-padding row: (size-2) entries of smooth_val,
    # one entry of confidence, zero at padding_idx.
    const_term = confidence * log_c + (size - 2) * smooth_val * log_s

    def kernel(x_ref, tgt_ref, out_ref):
        k = pl.program_id(1)                                     # vocab-tile idx

        tgt = tgt_ref[...]                                       # (TR, 1) int32
        not_pad = (tgt != jnp.int32(padding_idx)).astype(jnp.float32)   # (TR,1)

        # Initialize the resident per-row-tile accumulator with the constant
        # sum(p*log p) term, counted once per non-padding row (only at k == 0).
        @pl.when(k == 0)
        def _():
            n_valid = jnp.sum(not_pad)
            out_ref[...] = (jnp.zeros_like(out_ref)
                            + jnp.float32(const_term) * n_valid)

        x = x_ref[...].astype(jnp.float32)                       # (TR, TV) f32
        tv = x.shape[1]
        col = jax.lax.broadcasted_iota(jnp.int32, x.shape, 1) + k * tv

        # p (== true_dist), built without any logs:
        #   confidence at the target column, smooth_val elsewhere,
        #   0 at the padding_idx column and on rows whose target == padding_idx.
        p = jnp.where(col == tgt, jnp.float32(confidence), jnp.float32(smooth_val))
        p = jnp.where(col == jnp.int32(padding_idx), jnp.float32(0.0), p)
        p = p * not_pad

        # loss = sum(p*log p) - sum(p*x); accumulate -sum(p*x) across vocab tiles.
        out_ref[...] = out_ref[...] - jnp.sum(p * x)

    def loss_fn(x, target):
        n, v = x.shape
        assert v == size

        # ---- lane-dense, VMEM-friendly tile sizes ---------------------------
        lane, max_tv, max_tr = 128, 1024, 256
        vp = _round_up(v, lane)
        tv = vp if vp <= max_tv else max_tv
        vp = _round_up(vp, tv)

        tr = _round_up(n, 8) if n <= max_tr else max_tr
        np_ = _round_up(n, tr)

        # ---- pad to tile-aligned shapes (loss-neutral padding) --------------
        xp = x
        if (np_, vp) != (n, v):
            xp = jnp.zeros((np_, vp), x.dtype).at[:n, :v].set(x)
        tgt2d = jnp.full((np_, 1), padding_idx, jnp.int32)
        tgt2d = tgt2d.at[:n, 0].set(target.astype(jnp.int32))

        g_rows, g_v = np_ // tr, vp // tv

        partials = pl.pallas_call(
            kernel,
            out_shape=jax.ShapeDtypeStruct((g_rows, 8, 128), jnp.float32),
            grid_spec=pltpu.PrefetchScalarGridSpec(
                num_scalar_prefetch=0,
                grid=(g_rows, g_v),
                in_specs=[
                    pl.BlockSpec((tr, tv), lambda i, k: (i, k)),
                    pl.BlockSpec((tr, 1), lambda i, k: (i, 0)),   # reused over k
                ],
                out_specs=pl.BlockSpec((1, 8, 128), lambda i, k: (i, 0, 0)),
            ),
            compiler_params=pltpu.CompilerParams(
                dimension_semantics=("parallel", "arbitrary")),
        )(xp, tgt2d)

        # Every element of a row-tile's (8,128) block holds the same partial.
        return jnp.sum(partials[:, 0, 0])

    return loss_fn


def _reference_loss(x, target, size, padding_idx, smoothing):
    # pure-JAX reference of the PyTorch module
    confidence = 1.0 - smoothing
    n, v = x.shape
    x = x.astype(jnp.float32)
    true_dist = jnp.full((n, v), smoothing / (size - 2), jnp.float32)
    true_dist = true_dist.at[jnp.arange(n), target].set(confidence)
    true_dist = true_dist.at[:, padding_idx].set(0.0)
    true_dist = jnp.where((target == padding_idx)[:, None], 0.0, true_dist)
    elem = jnp.where(true_dist > 0,
                     true_dist * (jnp.log(jnp.where(true_dist > 0, true_dist, 1.0)) - x),
                     0.0)
    return jnp.sum(elem)


if __name__ == "__main__":
    key = jax.random.PRNGKey(0)

    # --- case 1: module demo config (size=32, padding_idx=0, smoothing=0.1) ---
    SIZE, PAD, SMOOTH, N = 32, 0, 0.1, 8
    k1, k2, key = jax.random.split(key, 3)
    logits = jax.random.normal(k1, (N, SIZE), dtype=jnp.float32)
    x = jax.nn.log_softmax(logits, axis=-1)              # log-probs, KLDiv input
    target = jax.random.randint(k2, (N,), 0, SIZE, dtype=jnp.int32)
    target = target.at[3].set(PAD).at[6].set(PAD)        # exercise row masking

    loss_fn = make_label_smoothing_loss(SIZE, PAD, SMOOTH)
    loss = loss_fn(x, target)
    jax.block_until_ready(loss)
    ref = _reference_loss(x, target, SIZE, PAD, SMOOTH)
    assert jnp.allclose(loss, ref, rtol=1e-5, atol=1e-5), (loss, ref)

    # --- case 2: multi-tile path (row tiling, vocab tiling, padding) ----------
    SIZE2, PAD2, SMOOTH2, N2 = 3000, 0, 0.1, 300
    k3, k4, key = jax.random.split(key, 3)
    logits2 = jax.random.normal(k3, (N2, SIZE2), dtype=jnp.float32)
    x2 = jax.nn.log_softmax(logits2, axis=-1)
    target2 = jax.random.randint(k4, (N2,), 0, SIZE2, dtype=jnp.int32)
    target2 = target2.at[0].set(PAD2).at[17].set(PAD2).at[255].set(PAD2)

    loss_fn2 = make_label_smoothing_loss(SIZE2, PAD2, SMOOTH2)
    loss2 = loss_fn2(x2, target2)
    jax.block_until_ready(loss2)
    ref2 = _reference_loss(x2, target2, SIZE2, PAD2, SMOOTH2)
    assert jnp.allclose(loss2, ref2, rtol=1e-4, atol=1e-2), (loss2, ref2)

    print("KERNEL_OK")
</pallas_src>

<mosaic_0001>
module attributes {stable_mosaic.version = 11 : i64} {
  func.func @kernel(%arg0: i32, %arg1: i32, %arg2: memref<8x128xf32, #tpu.memory_space<vmem>>, %arg3: memref<8x1xi32, #tpu.memory_space<vmem>>, %arg4: memref<1x8x128xf32, #tpu.memory_space<vmem>>) attributes {dimension_semantics = [#tpu.dimension_semantics<parallel>, #tpu.dimension_semantics<arbitrary>], iteration_bounds = array<i64: 1, 1>, scalar_prefetch = 0 : i64, scratch_operands = 0 : i64, tpu.core_type = #tpu.core_type<tc>, window_params = [{transform_indices = @transform_0, window_bounds = array<i64: 8, 128>}, {transform_indices = @transform_1, window_bounds = array<i64: 8, 1>}, {transform_indices = @transform_2, window_bounds = array<i64: 1, 8, 128>}]} {
    %c0 = arith.constant 0 : index
    %c0_0 = arith.constant 0 : index
    %0 = vector.load %arg3[%c0, %c0_0] : memref<8x1xi32, #tpu.memory_space<vmem>>, vector<8x1xi32>
    %c0_i32 = arith.constant 0 : i32
    %1 = vector.broadcast %c0_i32 : i32 to vector<8x1xi32>
    %2 = arith.cmpi ne, %0, %1 : vector<8x1xi32>
    %3 = arith.extui %2 : vector<8x1xi1> to vector<8x1xi32>
    %4 = arith.sitofp %3 : vector<8x1xi32> to vector<8x1xf32>
    %c0_i32_1 = arith.constant 0 : i32
    %5 = arith.cmpi eq, %arg1, %c0_i32_1 : i32
    %6 = arith.extui %5 : i1 to i32
    %c0_i32_2 = arith.constant 0 : i32
    %7 = arith.cmpi ne, %6, %c0_i32_2 : i32
    scf.if %7 {
      %33 = vector.shape_cast %4 : vector<8x1xf32> to vector<1x8x1xf32>
      %cst_15 = arith.constant dense<0.000000e+00> : vector<1xf32>
      %34 = vector.multi_reduction <add>, %33, %cst_15 [1, 2] : vector<1x8x1xf32> to vector<1xf32>
      %35 = vector.shape_cast %34 : vector<1xf32> to vector<1x1x1xf32>
      %36 = vector.extract %35[0, 0, 0] : f32 from vector<1x1x1xf32>
      %cst_16 = arith.constant 0.000000e+00 : f32
      %37 = vector.broadcast %cst_16 : f32 to vector<1x8x128xf32>
      %cst_17 = arith.constant -0.665202737 : f32
      %38 = arith.mulf %cst_17, %36 : f32
      %39 = vector.broadcast %38 : f32 to vector<1x8x128xf32>
      %40 = arith.addf %37, %39 : vector<1x8x128xf32>
      %c0_18 = arith.constant 0 : index
      %c0_19 = arith.constant 0 : index
      %c0_20 = arith.constant 0 : index
      %41 = vector.load %arg4[%c0_18, %c0_19, %c0_20] : memref<1x8x128xf32, #tpu.memory_space<vmem>>, vector<1x8x128xf32>
      tpu.vector_store %arg4[%c0_18, %c0_19, %c0_20], %40 {strides = array<i32>} : memref<1x8x128xf32, #tpu.memory_space<vmem>>, vector<1x8x128xf32>,
    } else {
    }
    %c0_3 = arith.constant 0 : index
    %c0_4 = arith.constant 0 : index
    %8 = vector.load %arg2[%c0_3, %c0_4] : memref<8x128xf32, #tpu.memory_space<vmem>>, vector<8x128xf32>
    %9 = tpu.iota {dimensions = array<i32: 1>} : vector<8x128xi32>
    %c128_i32 = arith.constant 128 : i32
    %10 = arith.muli %arg1, %c128_i32 : i32
    %11 = vector.broadcast %10 : i32 to vector<8x128xi32>
    %12 = arith.addi %9, %11 : vector<8x128xi32>
    %13 = vector.broadcast %0 : vector<8x1xi32> to vector<8x128xi32>
    %14 = arith.cmpi eq, %12, %13 : vector<8x128xi32>
    %cst = arith.constant 0.899999976 : f32
    %cst_5 = arith.constant 0.00333333341 : f32
    %15 = vector.broadcast %cst : f32 to vector<8x128xf32>
    %16 = vector.broadcast %cst_5 : f32 to vector<8x128xf32>
    %17 = arith.select %14, %15, %16 : vector<8x128xi1>, vector<8x128xf32>
    %c0_i32_6 = arith.constant 0 : i32
    %18 = vector.broadcast %c0_i32_6 : i32 to vector<8x128xi32>
    %19 = arith.cmpi eq, %12, %18 : vector<8x128xi32>
    %cst_7 = arith.constant 0.000000e+00 : f32
    %20 = vector.broadcast %cst_7 : f32 to vector<8x128xf32>
    %21 = arith.select %19, %20, %17 : vector<8x128xi1>, vector<8x128xf32>
    %22 = vector.broadcast %4 : vector<8x1xf32> to vector<8x128xf32>
    %23 = arith.mulf %21, %22 : vector<8x128xf32>
    %c0_8 = arith.constant 0 : index
    %c0_9 = arith.constant 0 : index
    %c0_10 = arith.constant 0 : index
    %24 = vector.load %arg4[%c0_8, %c0_9, %c0_10] : memref<1x8x128xf32, #tpu.memory_space<vmem>>, vector<1x8x128xf32>
    %25 = arith.mulf %23, %8 : vector<8x128xf32>
    %26 = vector.shape_cast %25 : vector<8x128xf32> to vector<1x8x128xf32>
    %cst_11 = arith.constant dense<0.000000e+00> : vector<1xf32>
    %27 = vector.multi_reduction <add>, %26, %cst_11 [1, 2] : vector<1x8x128xf32> to vector<1xf32>
    %28 = vector.shape_cast %27 : vector<1xf32> to vector<1x1x1xf32>
    %29 = vector.extract %28[0, 0, 0] : f32 from vector<1x1x1xf32>
    %30 = vector.broadcast %29 : f32 to vector<1x8x128xf32>
    %31 = arith.subf %24, %30 : vector<1x8x128xf32>
    %c0_12 = arith.constant 0 : index
    %c0_13 = arith.constant 0 : index
    %c0_14 = arith.constant 0 : index
    %32 = vector.load %arg4[%c0_12, %c0_13, %c0_14] : memref<1x8x128xf32, #tpu.memory_space<vmem>>, vector<1x8x128xf32>
    tpu.vector_store %arg4[%c0_12, %c0_13, %c0_14], %31 {strides = array<i32>} : memref<1x8x128xf32, #tpu.memory_space<vmem>>, vector<1x8x128xf32>,
    return
  }
  func.func @transform_0(%arg0: i32, %arg1: i32) -> (i32, i32) {
    %c0_i32 = arith.constant 0 : i32
    return %arg0, %arg1 : i32, i32
  }
  func.func @transform_1(%arg0: i32, %arg1: i32) -> (i32, i32) {
    %c0_i32 = arith.constant 0 : i32
    %c0_i32_0 = arith.constant 0 : i32
    return %arg0, %c0_i32 : i32, i32
  }
  func.func @transform_2(%arg0: i32, %arg1: i32) -> (i32, i32, i32) {
    %c0_i32 = arith.constant 0 : i32
    %c0_i32_0 = arith.constant 0 : i32
    %c0_i32_1 = arith.constant 0 : i32
    return %arg0, %c0_i32, %c0_i32_0 : i32, i32, i32
  }
}

</mosaic_0001>

<bundles_post_ra>
// kernel: tpu_custom_call.1
= control target key start
LH: loop header
LB: loop body
LE: loop exit
PB: predicated region body
PF: predicated region fallthrough
CT: control target
= control target key end

     0   :  { %vm20_vm0 = vcmask 7168   ;;  %s153_s0 = inlined_call_operand.vmem [shape: f32[8,128], index: 0, kind: input, shape index: {}]   ;;  %s154_s1 = inlined_call_operand.vmem [shape: s32[8,1], index: 1, kind: input, shape index: {}]   ;;  %s155_s2 = inlined_call_operand.hbm [shape: f32[1,8,128], index: 2, kind: output, shape index: {}]  }
   0x1   :  { %v12_v0 = vld [vmem:[%s154_s1] sm:$0xff] }
   0x2   :  { %7 = vsyncpa [#allocation3], 0  ;;  %v116_v1 = vmov 0   ;;  %vm13_vm1 = vcmp.ne.s32.totalorder %v12_v0, 0  ;;  %v117_v2 = vmov 0.0   ;;  %v36_v5 = vlaneseq  ;;  %v35_v12 = vld [vmem:[%s153_s0] sm:$0xff] }
   0x3   :  { %91 = vset.pattern.permute.xlu0 %v116_v1  ;;  %v82_v3 = vsel %vm13_vm1, 1.0, %v117_v2  ;;  %v118_v8 = vmov 0.0033333334   ;;  %s119_s13 = smov [#allocation2]  }
   0x4   :  { %42 = vperm.xlu0 %91, %v12_v0   ;;  %v21_v4 = vsel %vm20_vm0, %v82_v3, 0.0  ;;  %v37_v6 = vand.u32 127, %v36_v5  ;;  %s74_s14 = sshll.u32 %s119_s13, 4  ;;  %s75_s14 = int_to_ptr.vmem [resolvable:$true] %s74_s14 }
   0x5   :  { %22 = vadd.xlane.f32.xlu1 %v21_v4  ;;  %s92_s16 = scalar_lea.vmem %s75_s14, 128  ;;  %p97_p1 = scmp.lt.s32.totalorder %s75_s14, %s75_s14 }
   0x6   :  { %vm46_vm2 = vcmp.eq.s32.totalorder %v37_v6, 0  ;;  %p93_p0 = scmp.ne.s32.totalorder %s75_s14, %s92_s16  ;;  %p98_p2 = scmp.lt.s32.totalorder %s92_s16, %s92_s16 }
   0x8   :  { %50 = vperm.xlu0 %91, %v82_v3   ;;  %p99_p3 = por %p98_p2, %p97_p1 }
   0xa   :  { %p100_p4 = pnand %p99_p3, %p93_p0 }
  0x83   :  { %v43_v7 = vpop.permute.xlu0 %42 }
  0x84   :  { %vm44_vm3 = vcmp.eq.s32.totalorder %v37_v6, %v43_v7 }
  0x85   :  { %v45_v9 = vsel %vm44_vm3, 0.9, %v118_v8 }
  0x86   :  { %v47_v10 = vsel %vm46_vm2, 0.0, %v45_v9 }
  0x87   :  { %v51_v11 = vpop.permute.xlu0 %50 }
  0x88   :  { %v53_v13 = vmul.f32 %v51_v11, %v47_v10 }
  0x8a   :  { %v55_v14 = vmul.f32 %v53_v13, %v35_v12 }
  0x8c   :  { %56 = vadd.xlane.f32.xlu1 %v55_v14 }
  0x92   :  { %v23_v15 = vpop.xlane.xlu1 %22 }
  0x93   :  { %v24_v16 = vrot.slane %v23_v15, 4 }
  0x95   :  { %v25_v17 = vadd.f32 %v24_v16, %v23_v15 }
  0x97   :  { %v26_v18 = vrot.slane %v25_v17, 2 }
  0x99   :  { %v27_v19 = vadd.f32 %v26_v18, %v25_v17 }
  0x9b   :  { %v28_v20 = vrot.slane %v27_v19, 1 }
  0x9d   :  { %v29_v21 = vadd.f32 %v28_v20, %v27_v19 }
  0x9f   :  { %83 = vpush %v29_v21 }
  0xd0   :  { %s84_s0 = spop %83 }
  0xd1   :  { %s31_s12 = smul.f32 -0.66520274, %s84_s0 }
  0xd3   :  { %v32_v29 = vstv %s31_s12 }
 0x119   :  { %v57_v22 = vpop.xlane.xlu1 %56 }
 0x11a   :  { %v58_v23 = vrot.slane %v57_v22, 4 }
 0x11c   :  { %v59_v24 = vadd.f32 %v58_v23, %v57_v22 }
 0x11e   :  { %v60_v25 = vrot.slane %v59_v24, 2 }
 0x120   :  { %v61_v26 = vadd.f32 %v60_v25, %v59_v24 }
 0x122   :  { %v62_v27 = vrot.slane %v61_v26, 1 }
 0x124   :  { %v63_v28 = vadd.f32 %v62_v27, %v61_v26 }
 0x126   :  { %85 = vpush %v63_v28 }
 0x157   :  { %s86_s15 = spop %85 }
 0x158   :  { %v65_v30 = vstv %s86_s15 }
 0x159   :  { %v66_v31 = vsub.f32 %v32_v29, %v65_v30 }
 0x15b   :  { %67 = vst [vmem:[#allocation2] sm:$0xff] %v66_v31 }
 0x15c   :  { %103 = shalt.err (!%p100_p4)
}
 0x15d   :  { %s104_s19 = scalar_lea.hbm %s155_s2, 128 }
 0x15e   :  { %p105_p5 = scmp.ne.s32.totalorder %s155_s2, %s104_s19  ;;  %p108_p6 = scmp.lt.u32.totalorder %s104_s19, %s155_s2 }
 0x160   :  { %p110_p7 = pnand %p108_p6, %p105_p5 }
 0x162   :  { %113 = shalt.err (!%p110_p7)
}
 0x163   :  { %77 = dma.vmem_to_hbm [thread:$0]  %s75_s14, 128, %s155_s2, [#allocation3]  }
 0x164   :  { %114 = dma.done.wait [#allocation3], 128  }
 0x165   :  { %115 = vsyncadd [#allocation3], 4294967168 }
 0x166   :  { %81 = vsyncpa [#allocation3], 1 }

</bundles_post_ra>
